<compile_context>
chip_gen: v7x
topology: tpu7x:2x2x1
jax: 0.10.0
libtpu: 0.0.40
codegen_flags: <defaults>
</compile_context>

<pallas_src>
import functools

import numpy as np
import jax
import jax.numpy as jnp
from jax.experimental import pallas as pl
from jax.experimental.pallas import tpu as pltpu


def _resize_weight_matrix(in_size: int, out_size: int, antialias: bool = True) -> np.ndarray:
    """PIL / torchvision(antialias=True) bilinear (triangle-filter) weights.

    Returns a dense [out_size, in_size] matrix W such that `W @ x` resizes a
    length-`in_size` signal to length `out_size`.
    """
    scale = in_size / out_size
    support_scale = max(scale, 1.0) if antialias else 1.0
    w = np.zeros((out_size, in_size), dtype=np.float32)
    for i in range(out_size):
        center = (i + 0.5) * scale
        support = 1.0 * support_scale  # bilinear filter support = 1
        xmin = max(int(center - support + 0.5), 0)
        xmax = min(int(center + support + 0.5), in_size)
        js = np.arange(xmin, xmax, dtype=np.float64)
        x = (js + 0.5 - center) / support_scale
        wt = np.clip(1.0 - np.abs(x), 0.0, None)
        total = wt.sum()
        if total > 0.0:
            wt = wt / total
        w[i, xmin:xmax] = wt.astype(np.float32)
    return w


def _seg_kernel(img_ref, wh_ref, wwt_ref, cs_ref, cb_ref, out_ref, *, w_first: bool):
    """Processes all channels of one batch element per grid step.

    img_ref : (1, C*H, W)  uint8/float  — raw image slab (channels stacked on rows)
    wh_ref  : (Ho, H)      float32      — row-resize weights, 1/255 scale folded in
    wwt_ref : (W, Wo)      float32      — column-resize weights (pre-transposed)
    cs_ref  : (C,) SMEM    float32      — 1/std   (or 1 if normalize disabled)
    cb_ref  : (C,) SMEM    float32      — -mean/std (or 0)
    out_ref : (1, C, Ho, Wo) float32
    """
    _, CH, W = img_ref.shape
    _, C, Ho, Wo = out_ref.shape
    H = CH // C

    # convert_image_dtype cast happens in-kernel (the 1/255 scale lives in wh).
    x = img_ref[0].astype(jnp.float32)           # (C*H, W)
    wh = wh_ref[...]                             # (Ho, H)
    wwt = wwt_ref[...]                           # (W, Wo)

    if w_first:
        # One big MXU matmul over all channels (M = C*H), then small per-channel
        # H-contractions.
        t = jnp.dot(x, wwt, preferred_element_type=jnp.float32)      # (C*H, Wo)
        for c in range(C):
            y = jnp.dot(wh, t[c * H:(c + 1) * H],
                        preferred_element_type=jnp.float32)          # (Ho, Wo)
            out_ref[0, c] = y * cs_ref[c] + cb_ref[c]
    else:
        # Contract H first (cheaper when the resized H edge is the small one).
        for c in range(C):
            tc = jnp.dot(wh, x[c * H:(c + 1) * H],
                         preferred_element_type=jnp.float32)         # (Ho, W)
            y = jnp.dot(tc, wwt, preferred_element_type=jnp.float32)  # (Ho, Wo)
            out_ref[0, c] = y * cs_ref[c] + cb_ref[c]


def semantic_segmentation(img,
                          *,
                          resize_size=8,
                          normalize=True,
                          mean=(0.485, 0.456, 0.406),
                          std=(0.229, 0.224, 0.225),
                          antialias=True):
    # layout: NCHW
    B, C, H, W = img.shape

    # convert_image_dtype scale factor; folded into the row-resize weights.
    if jnp.issubdtype(img.dtype, jnp.integer):
        scale = 1.0 / float(jnp.iinfo(img.dtype).max)
    else:
        scale = 1.0

    if resize_size is not None:
        # torchvision F.resize with a single int: smaller edge -> resize_size.
        if H <= W:
            Ho, Wo = int(resize_size), int(resize_size * W / H)
        else:
            Ho, Wo = int(resize_size * H / W), int(resize_size)
        wh = _resize_weight_matrix(H, Ho, antialias)          # (Ho, H)
        ww = _resize_weight_matrix(W, Wo, antialias)          # (Wo, W)
    else:
        Ho, Wo = H, W
        wh = np.eye(H, dtype=np.float32)
        ww = np.eye(W, dtype=np.float32)

    wh = (wh * scale).astype(np.float32)                      # fold 1/255 into wh
    wwt = np.ascontiguousarray(ww.T, dtype=np.float32)        # (W, Wo) pre-transposed

    # Per-channel affine for normalize: y*cs + cb == (y - mean)/std.
    if normalize:
        mean_a = np.asarray(mean, np.float32)
        std_a = np.asarray(std, np.float32)
        cs = (1.0 / std_a).astype(np.float32)
        cb = (-mean_a / std_a).astype(np.float32)
    else:
        cs = np.ones((C,), np.float32)
        cb = np.zeros((C,), np.float32)

    # Static contraction-order choice (FLOPs), with a mild preference for the
    # W-first order since it batches all channels into one large-M matmul.
    cost_w_first = H * Wo * (W + Ho)
    cost_h_first = Ho * W * (H + Wo)
    w_first = cost_w_first <= 1.25 * cost_h_first

    # Keep the image in its original (narrow) dtype and stack channels onto the
    # row axis host-side (contiguous reshape = free metadata change, no HBM pass).
    img_slab = img.reshape(B, C * H, W)

    # Explicit VMEM budget (double-buffered uint8 block + weights + output + f32
    # intermediates), clamped to what every TPU generation can grant.
    itemsize = np.dtype(img.dtype).itemsize
    est = (2 * C * H * W * itemsize                 # double-buffered input block
           + 2 * 4 * (Ho * H + W * Wo)              # weight matrices
           + 2 * 4 * C * Ho * Wo                    # double-buffered output block
           + 2 * 4 * C * H * max(W, Wo)             # f32 cast + matmul intermediates
           + (2 << 20))                             # headroom
    vmem_limit = int(min(max(est, 32 * 1024 * 1024), 64 * 1024 * 1024))

    kernel = functools.partial(_seg_kernel, w_first=bool(w_first))

    out = pl.pallas_call(
        kernel,
        out_shape=jax.ShapeDtypeStruct((B, C, Ho, Wo), jnp.float32),
        grid=(B,),
        in_specs=[
            pl.BlockSpec((1, C * H, W), lambda b: (b, 0, 0)),
            pl.BlockSpec((Ho, H), lambda b: (0, 0)),
            pl.BlockSpec((W, Wo), lambda b: (0, 0)),
            pl.BlockSpec(memory_space=pltpu.MemorySpace.SMEM),
            pl.BlockSpec(memory_space=pltpu.MemorySpace.SMEM),
        ],
        out_specs=pl.BlockSpec((1, C, Ho, Wo), lambda b: (b, 0, 0, 0)),
        compiler_params=pltpu.CompilerParams(
            dimension_semantics=("parallel",),
            vmem_limit_bytes=vmem_limit),
    )(img_slab, jnp.asarray(wh), jnp.asarray(wwt), jnp.asarray(cs), jnp.asarray(cb))
    return out


if __name__ == "__main__":
    key = jax.random.PRNGKey(0)
    B, C, H, W = 2, 3, 16, 16
    img_u8 = jax.random.randint(key, (B, C, H, W), 0, 256, dtype=jnp.int32).astype(jnp.uint8)

    out = semantic_segmentation(img_u8, resize_size=8, normalize=True)
    out = jax.block_until_ready(out)

    assert out.shape == (B, C, 8, 8) and out.dtype == jnp.float32

    # Pure-JAX reference (same math, different op order) — sanity check.
    xf = img_u8.astype(jnp.float32) / 255.0
    wh_ref = jnp.asarray(_resize_weight_matrix(H, 8, True))
    ww_ref = jnp.asarray(_resize_weight_matrix(W, 8, True))
    ref = jnp.einsum('oh,bchw,wv->bcov', wh_ref, xf, ww_ref.T)
    mean = jnp.asarray((0.485, 0.456, 0.406), jnp.float32).reshape(1, 3, 1, 1)
    std = jnp.asarray((0.229, 0.224, 0.225), jnp.float32).reshape(1, 3, 1, 1)
    ref = (ref - mean) / std
    assert jnp.allclose(out, ref, atol=1e-2, rtol=1e-3), float(jnp.max(jnp.abs(out - ref)))

    print("KERNEL_OK")
</pallas_src>

<mosaic_0001>
module attributes {stable_mosaic.version = 11 : i64} {
  func.func @_seg_kernel(%arg0: i32, %arg1: memref<1x48x16xi8, #tpu.memory_space<vmem>>, %arg2: memref<8x16xf32, #tpu.memory_space<vmem>>, %arg3: memref<16x8xf32, #tpu.memory_space<vmem>>, %arg4: memref<3xf32, #tpu.memory_space<smem>>, %arg5: memref<3xf32, #tpu.memory_space<smem>>, %arg6: memref<1x3x8x8xf32, #tpu.memory_space<vmem>>) attributes {dimension_semantics = [#tpu.dimension_semantics<parallel>], iteration_bounds = array<i64: 2>, scalar_prefetch = 0 : i64, scratch_operands = 0 : i64, tpu.core_type = #tpu.core_type<tc>, window_params = [{transform_indices = @transform_0, window_bounds = array<i64: 1, 48, 16>}, {pipeline_mode = #tpu.pipeline_mode<synchronous>, transform_indices = @transform_1, window_bounds = array<i64: 8, 16>}, {pipeline_mode = #tpu.pipeline_mode<synchronous>, transform_indices = @transform_2, window_bounds = array<i64: 16, 8>}, {transform_indices = @transform_3, window_bounds = array<i64: 3>}, {transform_indices = @transform_4, window_bounds = array<i64: 3>}, {transform_indices = @transform_5, window_bounds = array<i64: 1, 3, 8, 8>}]} {
    %c0 = arith.constant 0 : index
    %c0_0 = arith.constant 0 : index
    %c0_1 = arith.constant 0 : index
    %0 = vector.load %arg1[%c0, %c0_0, %c0_1] : memref<1x48x16xi8, #tpu.memory_space<vmem>>, vector<1x48x16xi8>
    %1 = vector.shape_cast %0 : vector<1x48x16xi8> to vector<48x16xi8>
    %2 = arith.uitofp %1 : vector<48x16xi8> to vector<48x16xf32>
    %c0_2 = arith.constant 0 : index
    %c0_3 = arith.constant 0 : index
    %3 = vector.load %arg2[%c0_2, %c0_3] : memref<8x16xf32, #tpu.memory_space<vmem>>, vector<8x16xf32>
    %c0_4 = arith.constant 0 : index
    %c0_5 = arith.constant 0 : index
    %4 = vector.load %arg3[%c0_4, %c0_5] : memref<16x8xf32, #tpu.memory_space<vmem>>, vector<16x8xf32>
    %cst = arith.constant dense<0.000000e+00> : vector<48x8xf32>
    %5 = tpu.matmul %2, %4, %cst {dimension_numbers = #tpu.dot_dimension_numbers<[1], [0], [0], [1], [0, 0, 1, 1], [], []>} : vector<48x16xf32>, vector<16x8xf32>, vector<48x8xf32> -> vector<48x8xf32>
    %6 = vector.extract_strided_slice %5 {offsets = [0, 0], sizes = [16, 8], strides = [1, 1]} : vector<48x8xf32> to vector<16x8xf32>
    %cst_6 = arith.constant dense<0.000000e+00> : vector<8x8xf32>
    %7 = tpu.matmul %3, %6, %cst_6 {dimension_numbers = #tpu.dot_dimension_numbers<[1], [0], [0], [1], [0, 0, 1, 1], [], []>} : vector<8x16xf32>, vector<16x8xf32>, vector<8x8xf32> -> vector<8x8xf32>
    %c0_7 = arith.constant 0 : index
    %8 = memref.load %arg4[%c0_7] : memref<3xf32, #tpu.memory_space<smem>>
    %9 = vector.broadcast %8 : f32 to vector<8x8xf32>
    %10 = arith.mulf %7, %9 : vector<8x8xf32>
    %c0_8 = arith.constant 0 : index
    %11 = memref.load %arg5[%c0_8] : memref<3xf32, #tpu.memory_space<smem>>
    %12 = vector.broadcast %11 : f32 to vector<8x8xf32>
    %13 = arith.addf %10, %12 : vector<8x8xf32>
    %c0_9 = arith.constant 0 : index
    %c0_10 = arith.constant 0 : index
    %c0_11 = arith.constant 0 : index
    %c0_12 = arith.constant 0 : index
    %14 = vector.load %arg6[%c0_9, %c0_10, %c0_11, %c0_12] : memref<1x3x8x8xf32, #tpu.memory_space<vmem>>, vector<1x1x8x8xf32>
    %15 = vector.shape_cast %14 : vector<1x1x8x8xf32> to vector<8x8xf32>
    %16 = vector.shape_cast %13 : vector<8x8xf32> to vector<1x1x8x8xf32>
    tpu.vector_store %arg6[%c0_9, %c0_10, %c0_11, %c0_12], %16 {strides = array<i32>} : memref<1x3x8x8xf32, #tpu.memory_space<vmem>>, vector<1x1x8x8xf32>,
    %17 = vector.extract_strided_slice %5 {offsets = [16, 0], sizes = [16, 8], strides = [1, 1]} : vector<48x8xf32> to vector<16x8xf32>
    %cst_13 = arith.constant dense<0.000000e+00> : vector<8x8xf32>
    %18 = tpu.matmul %3, %17, %cst_13 {dimension_numbers = #tpu.dot_dimension_numbers<[1], [0], [0], [1], [0, 0, 1, 1], [], []>} : vector<8x16xf32>, vector<16x8xf32>, vector<8x8xf32> -> vector<8x8xf32>
    %c1 = arith.constant 1 : index
    %19 = memref.load %arg4[%c1] : memref<3xf32, #tpu.memory_space<smem>>
    %20 = vector.broadcast %19 : f32 to vector<8x8xf32>
    %21 = arith.mulf %18, %20 : vector<8x8xf32>
    %c1_14 = arith.constant 1 : index
    %22 = memref.load %arg5[%c1_14] : memref<3xf32, #tpu.memory_space<smem>>
    %23 = vector.broadcast %22 : f32 to vector<8x8xf32>
    %24 = arith.addf %21, %23 : vector<8x8xf32>
    %c0_15 = arith.constant 0 : index
    %c1_16 = arith.constant 1 : index
    %c0_17 = arith.constant 0 : index
    %c0_18 = arith.constant 0 : index
    %25 = vector.load %arg6[%c0_15, %c1_16, %c0_17, %c0_18] : memref<1x3x8x8xf32, #tpu.memory_space<vmem>>, vector<1x1x8x8xf32>
    %26 = vector.shape_cast %25 : vector<1x1x8x8xf32> to vector<8x8xf32>
    %27 = vector.shape_cast %24 : vector<8x8xf32> to vector<1x1x8x8xf32>
    tpu.vector_store %arg6[%c0_15, %c1_16, %c0_17, %c0_18], %27 {strides = array<i32>} : memref<1x3x8x8xf32, #tpu.memory_space<vmem>>, vector<1x1x8x8xf32>,
    %28 = vector.extract_strided_slice %5 {offsets = [32, 0], sizes = [16, 8], strides = [1, 1]} : vector<48x8xf32> to vector<16x8xf32>
    %cst_19 = arith.constant dense<0.000000e+00> : vector<8x8xf32>
    %29 = tpu.matmul %3, %28, %cst_19 {dimension_numbers = #tpu.dot_dimension_numbers<[1], [0], [0], [1], [0, 0, 1, 1], [], []>} : vector<8x16xf32>, vector<16x8xf32>, vector<8x8xf32> -> vector<8x8xf32>
    %c2 = arith.constant 2 : index
    %30 = memref.load %arg4[%c2] : memref<3xf32, #tpu.memory_space<smem>>
    %31 = vector.broadcast %30 : f32 to vector<8x8xf32>
    %32 = arith.mulf %29, %31 : vector<8x8xf32>
    %c2_20 = arith.constant 2 : index
    %33 = memref.load %arg5[%c2_20] : memref<3xf32, #tpu.memory_space<smem>>
    %34 = vector.broadcast %33 : f32 to vector<8x8xf32>
    %35 = arith.addf %32, %34 : vector<8x8xf32>
    %c0_21 = arith.constant 0 : index
    %c2_22 = arith.constant 2 : index
    %c0_23 = arith.constant 0 : index
    %c0_24 = arith.constant 0 : index
    %36 = vector.load %arg6[%c0_21, %c2_22, %c0_23, %c0_24] : memref<1x3x8x8xf32, #tpu.memory_space<vmem>>, vector<1x1x8x8xf32>
    %37 = vector.shape_cast %36 : vector<1x1x8x8xf32> to vector<8x8xf32>
    %38 = vector.shape_cast %35 : vector<8x8xf32> to vector<1x1x8x8xf32>
    tpu.vector_store %arg6[%c0_21, %c2_22, %c0_23, %c0_24], %38 {strides = array<i32>} : memref<1x3x8x8xf32, #tpu.memory_space<vmem>>, vector<1x1x8x8xf32>,
    return
  }
  func.func @transform_0(%arg0: i32) -> (i32, i32, i32) {
    %c0_i32 = arith.constant 0 : i32
    %c0_i32_0 = arith.constant 0 : i32
    %c0_i32_1 = arith.constant 0 : i32
    return %arg0, %c0_i32, %c0_i32_0 : i32, i32, i32
  }
  func.func @transform_1(%arg0: i32) -> (i32, i32) {
    %c0_i32 = arith.constant 0 : i32
    %c0_i32_0 = arith.constant 0 : i32
    %c0_i32_1 = arith.constant 0 : i32
    return %c0_i32, %c0_i32_0 : i32, i32
  }
  func.func @transform_2(%arg0: i32) -> (i32, i32) {
    %c0_i32 = arith.constant 0 : i32
    %c0_i32_0 = arith.constant 0 : i32
    %c0_i32_1 = arith.constant 0 : i32
    return %c0_i32, %c0_i32_0 : i32, i32
  }
  func.func @transform_3(%arg0: i32) -> i32 {
    %c0_i32 = arith.constant 0 : i32
    %c0_i32_0 = arith.constant 0 : i32
    return %c0_i32 : i32
  }
  func.func @transform_4(%arg0: i32) -> i32 {
    %c0_i32 = arith.constant 0 : i32
    %c0_i32_0 = arith.constant 0 : i32
    return %c0_i32 : i32
  }
  func.func @transform_5(%arg0: i32) -> (i32, i32, i32, i32) {
    %c0_i32 = arith.constant 0 : i32
    %c0_i32_0 = arith.constant 0 : i32
    %c0_i32_1 = arith.constant 0 : i32
    %c0_i32_2 = arith.constant 0 : i32
    return %arg0, %c0_i32, %c0_i32_0, %c0_i32_1 : i32, i32, i32, i32
  }
}

</mosaic_0001>

<bundles_post_ra>
// kernel: tpu_custom_call.1
= control target key start
LH: loop header
LB: loop body
LE: loop exit
PB: predicated region body
PF: predicated region fallthrough
CT: control target
= control target key end

     0   :  { %10 = vsyncpa [#allocation4], 0  ;;  %s1205_s0 = inlined_call_operand.vmem [shape: u8[2,48,16], index: 0, kind: input, shape index: {}]   ;;  %s1206_s1 = inlined_call_operand.vmem [shape: f32[8,16], index: 1, kind: input, shape index: {}]   ;;  %s1207_s2 = inlined_call_operand.vmem [shape: f32[16,8], index: 2, kind: input, shape index: {}]   ;;  %s1208_s3 = inlined_call_operand.vmem [shape: f32[3], index: 3, kind: input, shape index: {}]   ;;  %s1209_s4 = inlined_call_operand.vmem [shape: f32[3], index: 4, kind: input, shape index: {}]   ;;  %s1210_s5 = inlined_call_operand.hbm [shape: f32[2,3,8,8], index: 5, kind: output, shape index: {}]  }
   0x1   :  { %11 = vsyncpa [#allocation6], 0 }
   0x2   :  { %12 = vsyncpa [#allocation3], 0 }
   0x3   :  { %14 = vsyncpa [#allocation3 + $0x1], 0  ;;  %s1039_s18 = smov 0   ;;  %s1041_s19 = smov 0  }
   0x4   :  { %s1043_s20 = smov 0   ;;  %s1045_s21 = smov 0  }
   0x5 LB: > { %s1060_s22 = sadd.s32 4294967295, %s999_s21   ;;  %s726_s23 = sadd.s32 4294967294, %s999_s21   ;;  %s999_s21 = sphi %s1045_s21, %s1228_s21   ;;  %s995_s20 = sphi %s1043_s20, %s1227_s20   ;;  %s991_s19 = sphi %s1041_s19, %s1226_s19   ;;  %s987_s18 = sphi %s1039_s18, %s1225_s18  }
   0x6   : > { %s1064_s24 = sadd.s32 1, %s999_s21   ;;  %s137_s25 = sadd.s32 1, %s995_s20 }
   0x7   : > { %s134_s26 = ssub.s32 %s999_s21, %s1064_s24  ;;  %p147_p0 = scmp.ne.s32.totalorder %s995_s20, %s991_s19 }
   0x8   : > { %p135_p1 = scmp.eq.s32.totalorder %s134_s26, 0  ;;  %p148_p2 = scmp.eq.s32.totalorder %s1060_s22, 1 }
   0x9   : > { %p153_p3 = scmp.ne.s32.totalorder %s991_s19, %s987_s18  ;;  %p154_p4 = scmp.eq.s32.totalorder %s726_s23, 1 }
   0xa   : > { %s1075_s27 = scalar_select %p135_p1, %s995_s20, %s137_s25  }
   0xb   : > { %p1077_p5 = por %p148_p2, %p147_p0  ;;  %p1081_p6 = por %p154_p4, %p153_p3 }
   0xc   : > { %p727_p7 = scmp.ge.s32.totalorder %s999_s21, 1  ;;  %p161_p8 = scmp.lt.s32.totalorder %s999_s21, 3 }
   0xd   : > { %s1214_s28 = scalar_select %p1077_p5, 1, 0 }
   0xe   : > { %s1215_s29 = scalar_select %p1081_p6, 1, 0 }
   0xf   : > { %p1211_p9 = scmp.eq.s32.totalorder %s1060_s22, 0  ;;  %p1088_p10 = pnand %p727_p7, %p161_p8 }
  0x10   : > { %s180_s8 = sshll.u32 %s1208_s3, 4  ;;  %s191_s11 = sshll.u32 %s1209_s4, 4  ;;  %s181_s8 = int_to_ptr.vmem [resolvable:$true] %s180_s8  ;;  %s192_s11 = int_to_ptr.vmem [resolvable:$true] %s191_s11 }
  0x11   : > { %s1216_s30 = scalar_select %p1088_p10, 1, 0 }
  0x12   : > { %p844_p11 = pneg %p1088_p10  ;;  %s899_s13 = scalar_lea.vmem %s181_s8, 16 }
  0x13   : > { %p900_p13 = scmp.ne.s32.totalorder %s181_s8, %s899_s13  ;;  %p907_p3 = scmp.lt.s32.totalorder %s181_s8, %s181_s8 }
  0x14   : > { %p1102_p12 = pnand %p1211_p9, %p844_p11  ;;  %p908_p4 = scmp.lt.s32.totalorder %s899_s13, %s899_s13 }
  0x16   : > { %p901_p0 = pneg %p1102_p12  ;;  %p909_p7 = por %p908_p4, %p907_p3 }
  0x18   : > { %p902_p1 = pnand %p901_p0, %p900_p13 }
  0x1a   : > { %p903_p2 = pneg %p902_p1 }
  0x1c   : > { %p910_p8 = pnand %p909_p7, %p903_p2 }
  0x1e   : > { %913 = shalt.err (!%p910_p8)
}
  0x1f   : > { %s1001_s14 = smov [#allocation2]   ;;  %s914_s15 = scalar_lea.vmem %s192_s11, 16 }
  0x20   : > { %847 = dma.vmem_to_smem (!%p1102_p12), %s181_s8, 16, %s1001_s14, [#allocation4]  }
  0x21   : > { %p915_p11 = scmp.ne.s32.totalorder %s192_s11, %s914_s15  ;;  %p922_p5 = scmp.lt.s32.totalorder %s192_s11, %s192_s11 }
  0x22   : > { %p923_p10 = scmp.lt.s32.totalorder %s914_s15, %s914_s15 }
  0x23   : > { %p917_p9 = pnand %p915_p11, %p901_p0 }
  0x24   : > { %p924_p13 = por %p923_p10, %p922_p5 }
  0x25   : > { %p918_p6 = pneg %p917_p9 }
  0x27   : > { %p925_p1 = pnand %p924_p13, %p918_p6 }
  0x29   : > { %928 = shalt.err (!%p925_p1)
}
  0x2a   : > { %s1002_s16 = smov [#allocation5]   ;;  %p1218_p2 = scmp.ne.s32.totalorder %s1216_s30, 0 }
  0x2b   : > { %850 = dma.vmem_to_smem (!%p1102_p12), %s192_s11, 16, %s1002_s16, [#allocation6]  }
  0x2c   : > { %212 = sbr.rel (%p1218_p2) target bundleno = 530 (0x212), region = 40  ;;  %p1219_p3 = scmp.eq.s32.totalorder (!%p1218_p2), %s1060_s22, 0 }
  0x33   : > { %974 = dma.done.wait (%p1219_p3), [#allocation4], 16   ;;  %p1220_p4 = pmov %p1219_p3 }
  0x34   : > { %p1221_p9 = pmov %p1219_p3 }
  0x35   : > { %976 = vsyncadd (%p1220_p4), [#allocation4], 4294967280 }
  0x36   : > { %978 = dma.done.wait (%p1221_p9), [#allocation6], 16   ;;  %p1222_p5 = pmov %p1219_p3 }
  0x38   : > { %980 = vsyncadd (%p1222_p5), [#allocation6], 4294967280 }
  0x39   : > { %222 = sfence }
  0x3a   : > { %v275_v0 = vld [vmem:[%s1207_s2] sm:$0xff]  ;;  %v276_v1 = vld [vmem:[%s1207_s2 + $0x8] sm:$0xff]  ;;  %p245_p6 = scmp.lt.s32.totalorder %s1060_s22, 1  ;;  %vm277_vm0 = vcmask 130048   ;;  %v1003_v23 = vmov 0.0|0.0   ;;  %vm1004_vm1 = vmmov 0  }
  0x3b   : > { %v816_v2 = vpack.c.bf16 %v276_v1, %v275_v0  ;;  %820 = vmatprep.subr.bf16.mxu1 %v1003_v23  ;;  %v1005_v24 = vmov 0.0   ;;  %v274_v29 = vld [vmem:[%s1206_s1] sm:$0xff]  ;;  %s464_s12 = sld [smem:[#allocation2]]  ;;  %s743_s14 = sld [smem:[#allocation2 + $0x1]]  ;;  %vm470_vm2 = vcmask 64512  }
  0x3c   : > { %s246_s30 = scalar_select %p245_p6, %s1060_s22, 1  ;;  %799 = vmatprep.mubr.msk.f32.mxu1 %vm1004_vm1, %v1005_v24 }
  0x3d   : > { %817 = vmatprep.subr.bf16.mxu0 %v816_v2  ;;  %s467_s13 = sld [smem:[#allocation5]]  ;;  %s242_s15 = sand.u32 1, %s991_s19  }
  0x3e   : > { %819 = vmatpush3.bf16.msra.mxu0 %v816_v2  ;;  %s832_s6 = smul.u32 12, %s246_s30  ;;  %s744_s16 = sld [smem:[#allocation5 + $0x1]] }
  0x3f   : > { %s831_s17 = smul.u32 24, %s242_s15  ;;  %s747_s23 = sld [smem:[#allocation2 + $0x2]] }
  0x40   : > { %s249_s9 = scalar_lea.vmem %s1205_s0, %s832_s6  ;;  %s748_s25 = sld [smem:[#allocation5 + $0x2]] }
  0x41   : > { %v754_v3 = vld [vmem:[%s249_s9] sm:$0xff]   ;;  %v830_v4 = vld [vmem:[%s249_s9 + $0x8] sm:$0xf]   ;;  %v465_v35 = vstv %s464_s12  ;;  %v543_v40 = vstv %s743_s14  ;;  %s244_s26 = scalar_lea.vmem [#allocation7], %s831_s17  ;;  %s833_s30 = smul.u32 384, %s1060_s22 }
  0x42   : > { %v755_v5 = vunpack.c.0.s8 %v754_v3  ;;  %v756_v6 = vunpack.c.1.s8 %v754_v3  ;;  %v759_v7 = vunpack.c.2.s8 %v754_v3  ;;  %v760_v8 = vunpack.c.3.s8 %v754_v3  ;;  %s642_s6 = sshll.u32 %s244_s26, 4  ;;  %s1164_s22 = scalar_lea.sflag [#allocation3], %s242_s15  ;;  %s1154_s6 = int_to_ptr.vmem [resolvable:$true] %s642_s6 }
  0x43   : > { %v763_v9 = vunpack.c.0.s8 %v830_v4  ;;  %v764_v14 = vunpack.c.1.s8 %v830_v4  ;;  %v468_v37 = vstv %s467_s13  ;;  %s1159_s9 = scalar_lea.hbm %s1210_s5, %s833_s30  ;;  %s929_s10 = scalar_lea.vmem %s1154_s6, 384 }
  0x44   : > { %v262_v10 = vand.u32 255, %v755_v5  ;;  %v263_v11 = vand.u32 255, %v756_v6  ;;  %v264_v12 = vand.u32 255, %v759_v7  ;;  %v265_v13 = vand.u32 255, %v760_v8  ;;  %p930_p10 = scmp.ne.s32.totalorder %s1154_s6, %s929_s10  ;;  %p1223_p12 = scmp.ne.s32.totalorder %s1214_s28, 0 }
  0x45   : > { %v266_v18 = vand.u32 255, %v763_v9  ;;  %v267_v20 = vand.u32 255, %v764_v14  ;;  %v546_v43 = vstv %s744_s16  ;;  %v621_v46 = vstv %s747_s23  ;;  %s1006_s11 = smov [#allocation7]  }
  0x46   : > { %v268_v15 = vcvt.s32.f32 %v262_v10  ;;  %v269_v16 = vcvt.s32.f32 %v263_v11  ;;  %v270_v17 = vcvt.s32.f32 %v264_v12  ;;  %v271_v19 = vcvt.s32.f32 %v265_v13  ;;  %p931_p0 = pnand %p930_p10, %p1223_p12  ;;  %s933_s12 = sshll.u32 %s1006_s11, 4  ;;  %s934_s12 = int_to_ptr.vmem [resolvable:$false] %s933_s12 }
  0x47   : > { %v272_v21 = vcvt.s32.f32 %v266_v18  ;;  %v273_v22 = vcvt.s32.f32 %v267_v20  ;;  %v624_v49 = vstv %s748_s25  ;;  %s935_s13 = scalar_lea.vmem %s934_s12, 768  ;;  %p936_p8 = scmp.lt.s32.totalorder %s1154_s6, %s934_s12 }
  0x48   : > { %786 = vmatprep.mubr.msk.f32.mxu0 %vm277_vm0, %v268_v15  ;;  %p932_p7 = pneg %p931_p0  ;;  %p937_p11 = scmp.lt.s32.totalorder %s935_s13, %s929_s10 }
  0x49   : > { %787 = vmatmul.mubr.msk.f32.vlgmr.msra.gmra.mrb[0].mxu0 %vm277_vm0, %v269_v16 }
  0x4a   : > { %789 = vmatprep.mubr.msk.f32.mxu0 %vm277_vm0, %v270_v17  ;;  %p938_p13 = por %p937_p11, %p936_p8 }
  0x4c   : > { %p939_p1 = pnand %p938_p13, %p932_p7 }
  0x4d   : > { %790 = vmatmul.mubr.msk.f32.gmra.mrb[2].mxu0 %vm277_vm0, %v271_v19 }
  0x4e   : > { %792 = vmatprep.mubr.msk.f32.mxu0 %vm277_vm0, %v272_v21 }
  0x51   : > { %793 = vmatmul.mubr.msk.f32.gmra.mrb[4].mxu0 %vm277_vm0, %v273_v22 }
 0x11c   : > { %v788_v25 = vpop.f32.mrb[0].mxu0 }
 0x11d   : > { %v362_v26 = vpop.f32.mrb[1].mxu0 }
 0x11e   : > { %v821_v27 = vpack.c.bf16 %v788_v25, %v362_v26 }
 0x120   : > { %v791_v28 = vpop.f32.mrb[2].mxu0  ;;  %822 = vmatpush3.bf16.msra.mxu1 %v821_v27 }
 0x121   : > { %v372_v30 = vpop.f32.mrb[3].mxu0  ;;  %823 = vmatprep.subr.bf16.mxu1 %v1003_v23 }
 0x122   : > { %v824_v31 = vpack.c.bf16 %v791_v28, %v372_v30 }
 0x123   : > { %800 = vmatmul.mubr.msk.f32.vlgmr.msra.gmra.mrb[0].mxu1 %vm277_vm0, %v274_v29 }
 0x124   : > { %v794_v32 = vpop.f32.mrb[4].mxu0  ;;  %825 = vmatpush3.bf16.msra.mxu1 %v824_v31  ;;  %806 = vmatprep.mubr.msk.f32.mxu1 %vm1004_vm1, %v1005_v24 }
 0x125   : > { %v382_v33 = vpop.f32.mrb[5].mxu0  ;;  %826 = vmatprep.subr.bf16.mxu1 %v1003_v23 }
 0x126   : > { %v827_v34 = vpack.c.bf16 %v794_v32, %v382_v33 }
 0x127   : > { %807 = vmatmul.mubr.msk.f32.vlgmr.msra.gmra.mrb[2].mxu1 %vm277_vm0, %v274_v29 }
 0x128   : > { %828 = vmatpush3.bf16.msra.mxu1 %v827_v34  ;;  %813 = vmatprep.mubr.msk.f32.mxu1 %vm1004_vm1, %v1005_v24 }
 0x12b   : > { %814 = vmatmul.mubr.msk.f32.vlgmr.msra.gmra.mrb[4].mxu1 %vm277_vm0, %v274_v29 }
 0x1f6   : > { %v460_v36 = vpop.f32.mrb[0].mxu1 }
 0x1f7   : > { %v466_v38 = vmul.f32 %v465_v35, %v460_v36  ;;  %v801_v39 = vpop.f32.mrb[1].mxu1 }
 0x1f9   : > { %v469_v41 = vadd.f32 %v468_v37, %v466_v38 }
 0x1fa   : > { %v538_v42 = vpop.f32.mrb[2].mxu1 }
 0x1fb   : > { %471 = vst.msk [vmem:[%s244_s26] sm:$0xff] %vm470_vm2, %v469_v41  ;;  %v544_v44 = vmul.f32 %v543_v40, %v538_v42  ;;  %v808_v45 = vpop.f32.mrb[3].mxu1 }
 0x1fd   : > { %v547_v47 = vadd.f32 %v546_v43, %v544_v44 }
 0x1fe   : > { %v616_v48 = vpop.f32.mrb[4].mxu1 }
 0x1ff   : > { %745 = vst.msk [vmem:[%s244_s26 + $0x8] sm:$0xff] %vm470_vm2, %v547_v47  ;;  %v622_v50 = vmul.f32 %v621_v46, %v616_v48  ;;  %v815_v51 = vpop.f32.mrb[5].mxu1 }
 0x201   : > { %v625_v52 = vadd.f32 %v624_v49, %v622_v50 }
 0x203   : > { %749 = vst.msk [vmem:[%s244_s26 + $0x10] sm:$0xff] %vm470_vm2, %v625_v52 }
 0x204   : > { %942 = shalt.err (!%p939_p1)
}
 0x205   : > { %s943_s14 = scalar_lea.hbm %s1159_s9, 384  ;;  %s947_s17 = scalar_lea.hbm %s1210_s5, 768 }
 0x206   : > { %p944_p2 = scmp.ne.s32.totalorder %s1159_s9, %s943_s14  ;;  %p948_p9 = scmp.lt.u32.totalorder %s1159_s9, %s1210_s5 }
 0x207   : > { %p949_p5 = scmp.lt.u32.totalorder %s947_s17, %s943_s14  ;;  %p951_p10 = scmp.lt.u32.totalorder %s943_s14, %s1159_s9 }
 0x208   : > { %p945_p3 = pnand %p944_p2, %p1223_p12 }
 0x209   : > { %p950_p6 = por %p949_p5, %p948_p9 }
 0x20a   : > { %p946_p4 = pneg %p945_p3 }
 0x20b   : > { %p952_p0 = por %p951_p10, %p950_p6 }
 0x20d   : > { %p953_p7 = pnand %p952_p0, %p946_p4 }
 0x20f   : > { %956 = shalt.err (!%p953_p7)
}
 0x210   : > { %s1007_s26 = smov 128   ;;  %s1008_s30 = smov 8  }
 0x211   : > { %842 = dma.vmem_to_hbm [thread:$0]  (%p1223_p12), %s1154_s6, 384, %s1159_s9, %s1164_s22, %s1007_s26, %s1007_s26, %s1008_s30  }
 0x212 PF: > { %p859_p8 = scmp.ge.s32.totalorder %s999_s21, 2  ;;  %s657_s7 = sand.u32 1, %s987_s18  }
 0x213   : > { %p1224_p11 = scmp.ne.s32.totalorder %s1215_s29, 0  ;;  %s658_s8 = scalar_lea.sflag [#allocation3], %s657_s7 }
 0x215   : > { %p852_p13 = pnand %p859_p8, %p1224_p11 }
 0x217   : > { %982 = dma.done.wait (!%p852_p13), %s658_s8, 384  }
 0x218   : > { %984 = vsyncadd (!%p852_p13), %s658_s8, 4294966912  ;;  %p17_p1 = scmp.ge.s32.totalorder %s1064_s24, 4   ;;  %s1225_s18 = smov %s991_s19 }
 0x219   : > { %s1226_s19 = smov %s995_s20  ;;  %s1227_s20 = smov %s1075_s27 }
 0x21a   : > { %s1228_s21 = smov %s1064_s24  ;;  %19 = sbr.rel (!%p17_p1) target bundleno = 5 (0x5), region = 86 }
 0x221   :  { %663 = vsyncpa [#allocation3], 1 }
 0x222   :  { %665 = vsyncpa [#allocation3 + $0x1], 1 }
 0x223   :  { %666 = vsyncpa [#allocation4], 1 }
 0x224   :  { %668 = vsyncpa [#allocation4 + $0x1], 1 }
 0x225   :  { %669 = vsyncpa [#allocation6], 1 }

</bundles_post_ra>
